<compile_context>
chip_gen: v6e
topology: v6e:2x2x1
jax: 0.10.0
libtpu: 0.0.40
codegen_flags: <defaults>
</compile_context>

<pallas_src>
import jax
import jax.numpy as jnp
from jax.experimental import pallas as pl
from jax.experimental.pallas import tpu as pltpu

LANE = 128            # TPU lane width
SUB = 8               # sublane granule
N_LAYERS = 4
W_ROWS = LANE         # padded weight rows (max input dim of a layer)
SLAB_ROWS = 144       # 128 weight rows + 1 bias row, padded to bf16 16-row packing


def _round_up(v, m):
    return ((v + m - 1) // m) * m


# ----------------------------------------------------------------------------
# Kernel: fused 4-layer MLP on one (tm, obs_dim) batch tile.
#   x_ref  : (tm, obs_dim)              f32
#   wb_ref : (N_LAYERS, 144, 128)       bf16  (rows 0..127 = W_l, row 128 = b_l)
#   out_ref: (tm, act_dim)              f32
# ----------------------------------------------------------------------------
def actor_kernel(x_ref, wb_ref, out_ref):
    obs_dim = x_ref.shape[-1]
    act_dim = out_ref.shape[-1]

    h = x_ref[...].astype(jnp.bfloat16)                    # bf16 MXU operand
    for l in range(N_LAYERS):                              # static unroll
        k = obs_dim if l == 0 else LANE                    # narrow K only for layer 0
        w = wb_ref[l, :k, :]                               # (k, 128) bf16
        b = wb_ref[l, W_ROWS:W_ROWS + 1, :].astype(jnp.float32)    # (1, 128) f32
        h = jnp.dot(h, w, preferred_element_type=jnp.float32) + b  # f32 accumulate
        if l < N_LAYERS - 1:
            h = jnp.maximum(h, 0.0).astype(jnp.bfloat16)   # ReLU in f32, next operand bf16
    # Only the real action lanes hit the EUP / HBM (narrow, lane-masked store is
    # still ~16x fewer bytes than a 128-wide store + wrapper slice).
    out_ref[...] = jnp.tanh(h[:, :act_dim]).astype(out_ref.dtype)


# ----------------------------------------------------------------------------
# Wrappers
# ----------------------------------------------------------------------------
def pack_params(params):
    """Pack [(W, b)] * 4 (W stored as (in, out)) into one bf16 (4, 144, 128) slab."""
    slab = jnp.zeros((N_LAYERS, SLAB_ROWS, LANE), dtype=jnp.bfloat16)
    for l, (w, b) in enumerate(params):
        fin, fout = w.shape
        assert fin <= W_ROWS and fout <= LANE
        slab = slab.at[l, :fin, :fout].set(w.astype(jnp.bfloat16))
        slab = slab.at[l, W_ROWS, :fout].set(b.reshape(-1).astype(jnp.bfloat16))
    return slab


def _pick_tile(B, tile_m):
    """Rows per batch tile: 1 tile for small B, 2 tiles for mid B (v7x dual-TC),
    tile_m-row tiles (>=512 recommended) for large B."""
    tile_m = max(SUB, _round_up(tile_m, SUB))
    b_aligned = _round_up(B, SUB)
    if b_aligned <= max(512, tile_m):
        return b_aligned
    if b_aligned <= 2 * tile_m:
        return _round_up(pl.cdiv(b_aligned, 2), SUB)
    return tile_m


def actor_forward(x, wb_slab, act_dim, *, tile_m=512):
    """x: (B, obs_dim) float.  wb_slab: (4, 144, 128) bf16 packed weights/biases."""
    B, obs_dim = x.shape
    assert obs_dim <= W_ROWS and act_dim <= LANE
    x = x.astype(jnp.float32)

    tm = _pick_tile(B, tile_m)
    b_pad = pl.cdiv(B, tm) * tm
    if b_pad != B:                      # batch-only pad (no lane padding in HBM)
        x = jnp.pad(x, ((0, b_pad - B), (0, 0)))

    out = pl.pallas_call(
        actor_kernel,
        out_shape=jax.ShapeDtypeStruct((b_pad, act_dim), jnp.float32),
        grid=(b_pad // tm,),
        in_specs=[
            pl.BlockSpec((tm, obs_dim), lambda i: (i, 0)),
            # Weight/bias slab, VMEM-resident across all batch tiles.
            pl.BlockSpec((N_LAYERS, SLAB_ROWS, LANE), lambda i: (0, 0, 0)),
        ],
        out_specs=pl.BlockSpec((tm, act_dim), lambda i: (i, 0)),
        compiler_params=pltpu.CompilerParams(
            dimension_semantics=("parallel",)),
        # TODO(synk): on v7x, pltpu.CORE_PARALLEL on this axis is the knob that
        # actually splits the batch grid across the two TensorCores.
    )(x, wb_slab)

    return out[:B] if b_pad != B else out


def actor_forward_agents(x, wb_slabs, act_dim, *, tile_m=512):
    """Fused multi-agent forward: x (A, B, obs_dim), wb_slabs (A, 4, 144, 128).
    All agents share (padded) obs/act dims; pad per-agent params to the max
    dims otherwise (zero-padding keeps results exact)."""
    A, B, obs_dim = x.shape
    assert wb_slabs.shape == (A, N_LAYERS, SLAB_ROWS, LANE)
    assert obs_dim <= W_ROWS and act_dim <= LANE
    x = x.astype(jnp.float32)

    tm = _pick_tile(B, tile_m)
    b_pad = pl.cdiv(B, tm) * tm
    if b_pad != B:
        x = jnp.pad(x, ((0, 0), (0, b_pad - B), (0, 0)))

    out = pl.pallas_call(
        actor_kernel,
        out_shape=jax.ShapeDtypeStruct((A, b_pad, act_dim), jnp.float32),
        grid=(A, b_pad // tm),
        in_specs=[
            pl.BlockSpec((None, tm, obs_dim), lambda a, i: (a, i, 0)),
            pl.BlockSpec((None, N_LAYERS, SLAB_ROWS, LANE),
                         lambda a, i: (a, 0, 0, 0)),
        ],
        out_specs=pl.BlockSpec((None, tm, act_dim), lambda a, i: (a, i, 0)),
        compiler_params=pltpu.CompilerParams(
            dimension_semantics=("parallel", "parallel")),
    )(x, wb_slabs)

    return out[:, :B] if b_pad != B else out


# ----------------------------------------------------------------------------
# Parameter init (matches nn.init.orthogonal_(std) + constant-bias semantics)
# ----------------------------------------------------------------------------
def orthogonal_init(key, fan_in, fan_out, std=1.0, dtype=jnp.float32):
    """Orthogonal init (gain=std).  Returns W with shape (in, out) for x @ W."""
    rows, cols = fan_out, fan_in              # PyTorch weight shape (out, in)
    flat = jax.random.normal(key, (max(rows, cols), min(rows, cols)),
                             dtype=jnp.float32)
    q, r = jnp.linalg.qr(flat)
    q = q * jnp.sign(jnp.diag(r))[None, :]
    if rows < cols:
        q = q.T
    w_torch = q[:rows, :cols] * std           # (out, in)
    return jnp.asarray(w_torch.T, dtype=dtype)  # (in, out)


def make_params(key, obs_dim, act_dim, hidden=64, bias_const=1e-6):
    dims = [(obs_dim, hidden), (hidden, hidden), (hidden, hidden),
            (hidden, act_dim)]
    keys = jax.random.split(key, len(dims))
    params = []
    for k, (fin, fout) in zip(keys, dims):
        w = orthogonal_init(k, fin, fout, std=1.0)
        b = jnp.full((1, fout), bias_const, dtype=jnp.float32)
        params.append((w, b))
    return params


# ----------------------------------------------------------------------------
# References
# ----------------------------------------------------------------------------
def reference_forward_f32(x, params):
    h = x.astype(jnp.float32)
    for i, (w, b) in enumerate(params):
        h = h @ w + b
        if i < len(params) - 1:
            h = jnp.maximum(h, 0.0)
    return jnp.tanh(h)


def reference_forward_bf16(x, params):
    """Mimics the kernel's precision: bf16 MXU operands, f32 everything else."""
    h = x.astype(jnp.float32)
    for i, (w, b) in enumerate(params):
        h = jnp.dot(h.astype(jnp.bfloat16), w.astype(jnp.bfloat16),
                    preferred_element_type=jnp.float32)
        h = h + b.astype(jnp.bfloat16).astype(jnp.float32)
        if i < len(params) - 1:
            h = jnp.maximum(h, 0.0)
    return jnp.tanh(h)


# TODO(synk): the module's Adam optimizer / .to(device) are training-side state
# and are intentionally not part of this forward-pass kernel.

if __name__ == "__main__":
    key = jax.random.PRNGKey(0)
    k_x, k_x2, k_xa, k_p0, k_p1, k_p2 = jax.random.split(key, 6)

    obs_dim = 16     # args.obs_shape[agent_id]
    act_dim = 8      # args.action_shape[agent_id]

    params = make_params(k_p0, obs_dim, act_dim)
    wb_slab = pack_params(params)

    # 1) Tiny per-agent forward (the module's usual call shape).
    x = jax.random.normal(k_x, (8, obs_dim), dtype=jnp.float32)
    out = jax.block_until_ready(actor_forward(x, wb_slab, act_dim))
    assert out.shape == (8, act_dim)
    assert jnp.allclose(out, reference_forward_bf16(x, params),
                        atol=2e-3, rtol=2e-3), "mismatch vs bf16 reference (B=8)"
    assert jnp.allclose(out, reference_forward_f32(x, params),
                        atol=5e-2, rtol=5e-2), "mismatch vs f32 reference (B=8)"

    # 2) Replay-buffer sized batch with an uneven row count (batch-only pad).
    x2 = jax.random.normal(k_x2, (300, obs_dim), dtype=jnp.float32)
    out2 = jax.block_until_ready(actor_forward(x2, wb_slab, act_dim))
    assert out2.shape == (300, act_dim)
    assert jnp.allclose(out2, reference_forward_bf16(x2, params),
                        atol=2e-3, rtol=2e-3), "mismatch vs bf16 reference (B=300)"
    assert jnp.allclose(out2, reference_forward_f32(x2, params),
                        atol=5e-2, rtol=5e-2), "mismatch vs f32 reference (B=300)"

    # 3) Multi-agent fused call: 3 actors x 8 env steps in one pallas_call.
    n_agents = 3
    agent_keys = [k_p0, k_p1, k_p2]
    agent_params = [make_params(k, obs_dim, act_dim) for k in agent_keys]
    wb_slabs = jnp.stack([pack_params(p) for p in agent_params])
    xa = jax.random.normal(k_xa, (n_agents, 8, obs_dim), dtype=jnp.float32)
    outa = jax.block_until_ready(actor_forward_agents(xa, wb_slabs, act_dim))
    assert outa.shape == (n_agents, 8, act_dim)
    for a in range(n_agents):
        assert jnp.allclose(outa[a], reference_forward_bf16(xa[a], agent_params[a]),
                            atol=2e-3, rtol=2e-3), f"mismatch vs bf16 reference (agent {a})"

    print("KERNEL_OK")
</pallas_src>

<mosaic_0001>
module attributes {stable_mosaic.version = 11 : i64} {
  func.func @actor_kernel(%arg0: i32, %arg1: memref<8x16xf32, #tpu.memory_space<vmem>>, %arg2: memref<4x144x128xbf16, #tpu.memory_space<vmem>>, %arg3: memref<8x8xf32, #tpu.memory_space<vmem>>) attributes {dimension_semantics = [#tpu.dimension_semantics<parallel>], iteration_bounds = array<i64: 1>, scalar_prefetch = 0 : i64, scratch_operands = 0 : i64, tpu.core_type = #tpu.core_type<tc>, window_params = [{transform_indices = @transform_0, window_bounds = array<i64: 8, 16>}, {pipeline_mode = #tpu.pipeline_mode<synchronous>, transform_indices = @transform_1, window_bounds = array<i64: 4, 144, 128>}, {transform_indices = @transform_2, window_bounds = array<i64: 8, 8>}]} {
    %c0 = arith.constant 0 : index
    %c0_0 = arith.constant 0 : index
    %0 = vector.load %arg1[%c0, %c0_0] : memref<8x16xf32, #tpu.memory_space<vmem>>, vector<8x16xf32>
    %1 = arith.truncf %0 : vector<8x16xf32> to vector<8x16xbf16>
    %c0_1 = arith.constant 0 : index
    %c0_2 = arith.constant 0 : index
    %c0_3 = arith.constant 0 : index
    %2 = vector.load %arg2[%c0_1, %c0_2, %c0_3] : memref<4x144x128xbf16, #tpu.memory_space<vmem>>, vector<1x16x128xbf16>
    %3 = vector.shape_cast %2 : vector<1x16x128xbf16> to vector<16x128xbf16>
    %c0_4 = arith.constant 0 : index
    %c128 = arith.constant 128 : index
    %c0_5 = arith.constant 0 : index
    %4 = vector.load %arg2[%c0_4, %c128, %c0_5] : memref<4x144x128xbf16, #tpu.memory_space<vmem>>, vector<1x1x128xbf16>
    %5 = vector.shape_cast %4 : vector<1x1x128xbf16> to vector<1x128xbf16>
    %6 = arith.extf %5 : vector<1x128xbf16> to vector<1x128xf32>
    %cst = arith.constant dense<0.000000e+00> : vector<8x128xf32>
    %7 = tpu.matmul %1, %3, %cst {dimension_numbers = #tpu.dot_dimension_numbers<[1], [0], [0], [1], [0, 0, 1, 1], [], []>} : vector<8x16xbf16>, vector<16x128xbf16>, vector<8x128xf32> -> vector<8x128xf32>
    %8 = vector.broadcast %6 : vector<1x128xf32> to vector<8x128xf32>
    %9 = arith.addf %7, %8 : vector<8x128xf32>
    %cst_6 = arith.constant 0.000000e+00 : f32
    %10 = vector.broadcast %cst_6 : f32 to vector<8x128xf32>
    %11 = arith.maximumf %9, %10 : vector<8x128xf32>
    %12 = arith.truncf %11 : vector<8x128xf32> to vector<8x128xbf16>
    %c1 = arith.constant 1 : index
    %c0_7 = arith.constant 0 : index
    %c0_8 = arith.constant 0 : index
    %13 = vector.load %arg2[%c1, %c0_7, %c0_8] : memref<4x144x128xbf16, #tpu.memory_space<vmem>>, vector<1x128x128xbf16>
    %14 = vector.shape_cast %13 : vector<1x128x128xbf16> to vector<128x128xbf16>
    %c1_9 = arith.constant 1 : index
    %c128_10 = arith.constant 128 : index
    %c0_11 = arith.constant 0 : index
    %15 = vector.load %arg2[%c1_9, %c128_10, %c0_11] : memref<4x144x128xbf16, #tpu.memory_space<vmem>>, vector<1x1x128xbf16>
    %16 = vector.shape_cast %15 : vector<1x1x128xbf16> to vector<1x128xbf16>
    %17 = arith.extf %16 : vector<1x128xbf16> to vector<1x128xf32>
    %cst_12 = arith.constant dense<0.000000e+00> : vector<8x128xf32>
    %18 = tpu.matmul %12, %14, %cst_12 {dimension_numbers = #tpu.dot_dimension_numbers<[1], [0], [0], [1], [0, 0, 1, 1], [], []>} : vector<8x128xbf16>, vector<128x128xbf16>, vector<8x128xf32> -> vector<8x128xf32>
    %19 = vector.broadcast %17 : vector<1x128xf32> to vector<8x128xf32>
    %20 = arith.addf %18, %19 : vector<8x128xf32>
    %cst_13 = arith.constant 0.000000e+00 : f32
    %21 = vector.broadcast %cst_13 : f32 to vector<8x128xf32>
    %22 = arith.maximumf %20, %21 : vector<8x128xf32>
    %23 = arith.truncf %22 : vector<8x128xf32> to vector<8x128xbf16>
    %c2 = arith.constant 2 : index
    %c0_14 = arith.constant 0 : index
    %c0_15 = arith.constant 0 : index
    %24 = vector.load %arg2[%c2, %c0_14, %c0_15] : memref<4x144x128xbf16, #tpu.memory_space<vmem>>, vector<1x128x128xbf16>
    %25 = vector.shape_cast %24 : vector<1x128x128xbf16> to vector<128x128xbf16>
    %c2_16 = arith.constant 2 : index
    %c128_17 = arith.constant 128 : index
    %c0_18 = arith.constant 0 : index
    %26 = vector.load %arg2[%c2_16, %c128_17, %c0_18] : memref<4x144x128xbf16, #tpu.memory_space<vmem>>, vector<1x1x128xbf16>
    %27 = vector.shape_cast %26 : vector<1x1x128xbf16> to vector<1x128xbf16>
    %28 = arith.extf %27 : vector<1x128xbf16> to vector<1x128xf32>
    %cst_19 = arith.constant dense<0.000000e+00> : vector<8x128xf32>
    %29 = tpu.matmul %23, %25, %cst_19 {dimension_numbers = #tpu.dot_dimension_numbers<[1], [0], [0], [1], [0, 0, 1, 1], [], []>} : vector<8x128xbf16>, vector<128x128xbf16>, vector<8x128xf32> -> vector<8x128xf32>
    %30 = vector.broadcast %28 : vector<1x128xf32> to vector<8x128xf32>
    %31 = arith.addf %29, %30 : vector<8x128xf32>
    %cst_20 = arith.constant 0.000000e+00 : f32
    %32 = vector.broadcast %cst_20 : f32 to vector<8x128xf32>
    %33 = arith.maximumf %31, %32 : vector<8x128xf32>
    %34 = arith.truncf %33 : vector<8x128xf32> to vector<8x128xbf16>
    %c3 = arith.constant 3 : index
    %c0_21 = arith.constant 0 : index
    %c0_22 = arith.constant 0 : index
    %35 = vector.load %arg2[%c3, %c0_21, %c0_22] : memref<4x144x128xbf16, #tpu.memory_space<vmem>>, vector<1x128x128xbf16>
    %36 = vector.shape_cast %35 : vector<1x128x128xbf16> to vector<128x128xbf16>
    %c3_23 = arith.constant 3 : index
    %c128_24 = arith.constant 128 : index
    %c0_25 = arith.constant 0 : index
    %37 = vector.load %arg2[%c3_23, %c128_24, %c0_25] : memref<4x144x128xbf16, #tpu.memory_space<vmem>>, vector<1x1x128xbf16>
    %38 = vector.shape_cast %37 : vector<1x1x128xbf16> to vector<1x128xbf16>
    %39 = arith.extf %38 : vector<1x128xbf16> to vector<1x128xf32>
    %cst_26 = arith.constant dense<0.000000e+00> : vector<8x128xf32>
    %40 = tpu.matmul %34, %36, %cst_26 {dimension_numbers = #tpu.dot_dimension_numbers<[1], [0], [0], [1], [0, 0, 1, 1], [], []>} : vector<8x128xbf16>, vector<128x128xbf16>, vector<8x128xf32> -> vector<8x128xf32>
    %41 = vector.broadcast %39 : vector<1x128xf32> to vector<8x128xf32>
    %42 = arith.addf %40, %41 : vector<8x128xf32>
    %43 = vector.extract_strided_slice %42 {offsets = [0, 0], sizes = [8, 8], strides = [1, 1]} : vector<8x128xf32> to vector<8x8xf32>
    %44 = math.tanh %43 : vector<8x8xf32>
    %c0_27 = arith.constant 0 : index
    %c0_28 = arith.constant 0 : index
    %45 = vector.load %arg3[%c0_27, %c0_28] : memref<8x8xf32, #tpu.memory_space<vmem>>, vector<8x8xf32>
    tpu.vector_store %arg3[%c0_27, %c0_28], %44 {strides = array<i32>} : memref<8x8xf32, #tpu.memory_space<vmem>>, vector<8x8xf32>,
    return
  }
  func.func @transform_0(%arg0: i32) -> (i32, i32) {
    %c0_i32 = arith.constant 0 : i32
    %c0_i32_0 = arith.constant 0 : i32
    return %arg0, %c0_i32 : i32, i32
  }
  func.func @transform_1(%arg0: i32) -> (i32, i32, i32) {
    %c0_i32 = arith.constant 0 : i32
    %c0_i32_0 = arith.constant 0 : i32
    %c0_i32_1 = arith.constant 0 : i32
    %c0_i32_2 = arith.constant 0 : i32
    return %c0_i32, %c0_i32_0, %c0_i32_1 : i32, i32, i32
  }
  func.func @transform_2(%arg0: i32) -> (i32, i32) {
    %c0_i32 = arith.constant 0 : i32
    %c0_i32_0 = arith.constant 0 : i32
    return %arg0, %c0_i32 : i32, i32
  }
}

</mosaic_0001>

<bundles_post_ra>
// kernel: tpu_custom_call.1
= control target key start
LH: loop header
LB: loop body
LE: loop exit
PB: predicated region body
PF: predicated region fallthrough
CT: control target
= control target key end

     0   :  { %7 = vsyncpa [#allocation3], 0  ;;  %s748_s0 = inlined_call_operand.hbm [shape: f32[8,16], index: 0, kind: input, shape index: {}]   ;;  %s749_s1 = inlined_call_operand.hbm [shape: bf16[4,144,128], index: 1, kind: input, shape index: {}]   ;;  %s750_s2 = inlined_call_operand.hbm [shape: f32[8,8], index: 2, kind: output, shape index: {}]  }
   0x1   :  { %8 = vsyncpa [#allocation6], 0 }
   0x2   :  { %9 = vsyncpa [#allocation4], 0  ;;  %s678_s9 = smov [#allocation2]   ;;  %s679_s11 = smov [#allocation5]  }
   0x3   :  { %s16_s10 = sshll.u32 %s678_s9, 4  ;;  %s25_s12 = sshll.u32 %s679_s11, 4  ;;  %s17_s10 = int_to_ptr.vmem [resolvable:$true] %s16_s10  ;;  %s26_s12 = int_to_ptr.vmem [resolvable:$true] %s25_s12 }
   0x4   :  { %s620_s13 = scalar_lea.vmem %s17_s10, 128  ;;  %p625_p1 = scmp.lt.s32.totalorder %s17_s10, %s17_s10 }
   0x5   :  { %p621_p0 = scmp.ne.s32.totalorder %s17_s10, %s620_s13  ;;  %p626_p2 = scmp.lt.s32.totalorder %s620_s13, %s620_s13 }
   0x7   :  { %p627_p3 = por %p626_p2, %p625_p1 }
   0x9   :  { %p628_p4 = pnand %p627_p3, %p621_p0 }
   0xb   :  { %631 = shalt.err (!%p628_p4)
}
   0xc   :  { %19 = dma.hbm_to_vmem [thread:$0]  %s748_s0, 128, %s17_s10, [#allocation3]  }
   0xd   :  { %s640_s16 = scalar_lea.vmem %s26_s12, 4608  ;;  %p645_p6 = scmp.lt.s32.totalorder %s26_s12, %s26_s12 }
   0xe   :  { %p641_p5 = scmp.ne.s32.totalorder %s26_s12, %s640_s16  ;;  %p646_p7 = scmp.lt.s32.totalorder %s640_s16, %s640_s16 }
  0x10   :  { %p647_p8 = por %p646_p7, %p645_p6 }
  0x12   :  { %p648_p9 = pnand %p647_p8, %p641_p5 }
  0x14   :  { %651 = shalt.err (!%p648_p9)
}
  0x15   :  { %s680_s17 = smov 64   ;;  %s681_s18 = smov 4  }
  0x16   :  { %31 = dma.hbm_to_vmem [thread:$0]  %s749_s1, 4608, %s26_s12, [#allocation6], %s680_s17, %s680_s17, %s681_s18  }
  0x17   :  { %672 = dma.done.wait [#allocation3], 128  }
  0x18   :  { %673 = vsyncadd [#allocation3], 4294967168 }
  0x19   :  { %674 = dma.done.wait [#allocation6], 4608  }
  0x1a   :  { %675 = vsyncadd [#allocation6], 4294962688  ;;  %v682_v0 = vmov 0.0   ;;  %vm683_vm0 = vmmov 0   ;;  %v585_v1 = vld [vmem:[#allocation5] sm:$0xff]   ;;  %v39_v2 = vld [vmem:[#allocation2] sm:$0xff]  ;;  %v45_v18 = vlaneseq }
  0x1b   :  { %512 = vmatprep.subr.bf16.mxu0 %v682_v0  ;;  %514 = vmatprep.mubr.msk.bf16.mxu0 %vm683_vm0, %v682_v0  ;;  %v40_v3 = vpack.c.bf16 %v39_v2, %v39_v2  ;;  %vm55_vm1 = vcmask 130048   ;;  %v586_v4 = vld [vmem:[#allocation5 + $0x80] sm:$0xff]   ;;  %v587_v5 = vld [vmem:[#allocation5 + $0x78] sm:$0xff]   ;;  %v588_v6 = vld [vmem:[#allocation5 + $0x70] sm:$0xff]   ;;  %s684_s0 = smov [#allocation7]   ;;  %vm439_vm2 = vcmask 64512  }
  0x1c   :  { %518 = vmatprep.subr.bf16.mxu1 %v682_v0  ;;  %534 = vmatprep.mubr.msk.bf16.mxu1 %vm683_vm0, %v682_v0  ;;  %v589_v7 = vld [vmem:[#allocation5 + $0x68] sm:$0xff]   ;;  %v590_v8 = vld [vmem:[#allocation5 + $0x60] sm:$0xff]   ;;  %v591_v9 = vld [vmem:[#allocation5 + $0x58] sm:$0xff]   ;;  %v46_v19 = vshrl.u32 %v45_v18, 7  ;;  %s447_s1 = sshll.u32 %s684_s0, 4  ;;  %s448_s1 = int_to_ptr.vmem [resolvable:$true] %s447_s1 }
  0x1d   :  { %513 = vmatpush3.bf16.msra.mxu0 %v585_v1  ;;  %519 = vmatpush3.bf16.msra.mxu1 %v586_v4  ;;  %v592_v10 = vld [vmem:[#allocation5 + $0x50] sm:$0xff]   ;;  %v593_v11 = vld [vmem:[#allocation5 + $0x48] sm:$0xff]   ;;  %v595_v13 = vld [vmem:[#allocation5 + $0xc0] sm:$0xff]   ;;  %s652_s21 = scalar_lea.vmem %s448_s1, 128  ;;  %p657_p11 = scmp.lt.s32.totalorder %s448_s1, %s448_s1 }
  0x1e   :  { %538 = vmatprep.subr.bf16.mxu0 %v682_v0  ;;  %520 = vmatprep.subr.bf16.mxu1 %v682_v0  ;;  %v594_v12 = vld [vmem:[#allocation5 + $0xc8] sm:$0xff]   ;;  %v596_v14 = vld [vmem:[#allocation5 + $0xb8] sm:$0xff]   ;;  %v597_v15 = vld [vmem:[#allocation5 + $0xb0] sm:$0xff]   ;;  %v729_v22 = vsub.s32 0, %v46_v19  ;;  %p653_p10 = scmp.ne.s32.totalorder %s448_s1, %s652_s21  ;;  %p658_p12 = scmp.lt.s32.totalorder %s652_s21, %s652_s21 }
  0x1f   :  { %v598_v16 = vld [vmem:[#allocation5 + $0xa8] sm:$0xff]   ;;  %v599_v17 = vld [vmem:[#allocation5 + $0xa0] sm:$0xff]   ;;  %v600_v31 = vld [vmem:[#allocation5 + $0x98] sm:$0xff]  }
  0x20   :  { %515 = vmatmul.mubr.msk.bf16.vlgmr.msra.gmra.mxu0 %vm55_vm1, %v40_v3  ;;  %v43_v20 = vld [vmem:[#allocation5 + $0x40] sm:$0x1]  ;;  %v601_v32 = vld [vmem:[#allocation5 + $0x90] sm:$0xff]   ;;  %v603_v34 = vld [vmem:[#allocation5 + $0x108] sm:$0xff]   ;;  %p659_p13 = por %p658_p12, %p657_p11 }
  0x21   :  { %554 = vmatprep.mubr.msk.bf16.mxu0 %vm683_vm0, %v682_v0  ;;  %521 = vmatpush3.bf16.msra.mxu1 %v587_v5  ;;  %v44_v21 = vunpack.c.l.bf16 %v43_v20  ;;  %v602_v33 = vld [vmem:[#allocation5 + $0x110] sm:$0xff]   ;;  %v604_v35 = vld [vmem:[#allocation5 + $0x100] sm:$0xff]   ;;  %v605_v36 = vld [vmem:[#allocation5 + $0xf8] sm:$0xff]  }
  0x22   :  { %522 = vmatprep.subr.bf16.mxu1 %v682_v0  ;;  %539 = vmatpush3.bf16.msra.mxu0 %v594_v12  ;;  %v606_v37 = vld [vmem:[#allocation5 + $0xf0] sm:$0xff]   ;;  %v607_v38 = vld [vmem:[#allocation5 + $0xe8] sm:$0xff]   ;;  %v608_v49 = vld [vmem:[#allocation5 + $0xe0] sm:$0xff]   ;;  %p660_p0 = pnand %p659_p13, %p653_p10 }
  0x23   :  { %540 = vmatprep.subr.bf16.mxu0 %v682_v0  ;;  %v48_v23 = vrot.slane %v44_v21, %v729_v22  ;;  %v118_v39 = vld [vmem:[#allocation5 + $0x88] sm:$0x1]  ;;  %v609_v50 = vld [vmem:[#allocation5 + $0xd8] sm:$0xff]   ;;  %v231_v51 = vld [vmem:[#allocation5 + $0xd0] sm:$0x1] }
  0x24   :  { %v119_v40 = vunpack.c.l.bf16 %v118_v39  ;;  %v232_v52 = vunpack.c.l.bf16 %v231_v51  ;;  %v344_v61 = vld [vmem:[#allocation5 + $0x118] sm:$0x1] }
  0x25   :  { %523 = vmatpush3.bf16.msra.mxu1 %v588_v6  ;;  %v345_v62 = vunpack.c.l.bf16 %v344_v61 }
  0x26   :  { %524 = vmatprep.subr.bf16.mxu1 %v682_v0  ;;  %541 = vmatpush3.bf16.msra.mxu0 %v595_v13  ;;  %v123_v41 = vrot.slane %v119_v40, %v729_v22  ;;  %v236_v53 = vrot.slane %v232_v52, %v729_v22 }
  0x27   :  { %542 = vmatprep.subr.bf16.mxu0 %v682_v0  ;;  %v349_v63 = vrot.slane %v345_v62, %v729_v22 }
  0x29   :  { %525 = vmatpush3.bf16.msra.mxu1 %v589_v7 }
  0x2a   :  { %526 = vmatprep.subr.bf16.mxu1 %v682_v0  ;;  %543 = vmatpush3.bf16.msra.mxu0 %v596_v14 }
  0x2b   :  { %544 = vmatprep.subr.bf16.mxu0 %v682_v0 }
  0x2d   :  { %527 = vmatpush3.bf16.msra.mxu1 %v590_v8 }
  0x2e   :  { %528 = vmatprep.subr.bf16.mxu1 %v682_v0  ;;  %545 = vmatpush3.bf16.msra.mxu0 %v597_v15 }
  0x2f   :  { %546 = vmatprep.subr.bf16.mxu0 %v682_v0 }
  0x31   :  { %529 = vmatpush3.bf16.msra.mxu1 %v591_v9 }
  0x32   :  { %530 = vmatprep.subr.bf16.mxu1 %v682_v0  ;;  %547 = vmatpush3.bf16.msra.mxu0 %v598_v16 }
  0x33   :  { %548 = vmatprep.subr.bf16.mxu0 %v682_v0 }
  0x35   :  { %531 = vmatpush3.bf16.msra.mxu1 %v592_v10 }
  0x36   :  { %532 = vmatprep.subr.bf16.mxu1 %v682_v0  ;;  %549 = vmatpush3.bf16.msra.mxu0 %v599_v17 }
  0x37   :  { %550 = vmatprep.subr.bf16.mxu0 %v682_v0 }
  0x39   :  { %533 = vmatpush3.bf16.msra.mxu1 %v593_v11 }
  0x3a   :  { %558 = vmatprep.subr.bf16.mxu1 %v682_v0  ;;  %551 = vmatpush3.bf16.msra.mxu0 %v600_v31 }
  0x3b   :  { %552 = vmatprep.subr.bf16.mxu0 %v682_v0 }
  0x3e   :  { %553 = vmatpush3.bf16.msra.mxu0 %v601_v32 }
  0xe0   :  { %v93_v24 = vpop.f32.mrf.mxu0 }
  0xe1   :  { %v94_v25 = vadd.f32 %v93_v24, %v48_v23 }
  0xe2   :  { %v516_v26 = vpop.f32.mrf.mxu0 }
  0xe3   :  { %v99_v27 = vmax.f32 %v94_v25, 0.0 }
  0xe4   :  { %v96_v28 = vpop.f32.mrf.mxu0 }
  0xe5   :  { %v100_v29 = vpack.c.bf16 %v99_v27, %v99_v27 }
  0xe6   :  { %v517_v30 = vpop.f32.mrf.mxu0 }
  0xe7   :  { %535 = vmatmul.mubr.bf16.vlgmr.msra.gmra.mxu1 %v100_v29 }
  0xe8   :  { %574 = vmatprep.mubr.msk.bf16.mxu1 %vm683_vm0, %v682_v0  ;;  %559 = vmatpush3.bf16.msra.mxu1 %v602_v33 }
  0xe9   :  { %560 = vmatprep.subr.bf16.mxu1 %v682_v0 }
  0xec   :  { %561 = vmatpush3.bf16.msra.mxu1 %v603_v34 }
  0xed   :  { %562 = vmatprep.subr.bf16.mxu1 %v682_v0 }
  0xf0   :  { %563 = vmatpush3.bf16.msra.mxu1 %v604_v35 }
  0xf1   :  { %564 = vmatprep.subr.bf16.mxu1 %v682_v0 }
  0xf4   :  { %565 = vmatpush3.bf16.msra.mxu1 %v605_v36 }
  0xf5   :  { %566 = vmatprep.subr.bf16.mxu1 %v682_v0 }
  0xf8   :  { %567 = vmatpush3.bf16.msra.mxu1 %v606_v37 }
  0xf9   :  { %568 = vmatprep.subr.bf16.mxu1 %v682_v0 }
  0xfc   :  { %569 = vmatpush3.bf16.msra.mxu1 %v607_v38 }
  0xfd   :  { %570 = vmatprep.subr.bf16.mxu1 %v682_v0 }
 0x100   :  { %571 = vmatpush3.bf16.msra.mxu1 %v608_v49 }
 0x101   :  { %572 = vmatprep.subr.bf16.mxu1 %v682_v0 }
 0x104   :  { %573 = vmatpush3.bf16.msra.mxu1 %v609_v50 }
 0x1a7   :  { %v206_v42 = vpop.f32.mrf.mxu1 }
 0x1a8   :  { %v207_v43 = vadd.f32 %v206_v42, %v123_v41 }
 0x1a9   :  { %v536_v44 = vpop.f32.mrf.mxu1 }
 0x1aa   :  { %v212_v45 = vmax.f32 %v207_v43, 0.0 }
 0x1ab   :  { %v209_v46 = vpop.f32.mrf.mxu1 }
 0x1ac   :  { %v213_v47 = vpack.c.bf16 %v212_v45, %v212_v45 }
 0x1ad   :  { %v537_v48 = vpop.f32.mrf.mxu1 }
 0x1ae   :  { %555 = vmatmul.mubr.bf16.vlgmr.msra.gmra.mxu0 %v213_v47 }
 0x26e   :  { %v319_v54 = vpop.f32.mrf.mxu0 }
 0x26f   :  { %v320_v55 = vadd.f32 %v319_v54, %v236_v53 }
 0x270   :  { %v556_v56 = vpop.f32.mrf.mxu0 }
 0x271   :  { %v325_v57 = vmax.f32 %v320_v55, 0.0 }
 0x272   :  { %v322_v58 = vpop.f32.mrf.mxu0 }
 0x273   :  { %v326_v59 = vpack.c.bf16 %v325_v57, %v325_v57 }
 0x274   :  { %v557_v60 = vpop.f32.mrf.mxu0 }
 0x275   :  { %575 = vmatmul.mubr.bf16.vlgmr.msra.gmra.mxu1 %v326_v59 }
 0x335   :  { %v432_v1 = vpop.f32.mrf.mxu1 }
 0x336   :  { %v433_v0 = vadd.f32 %v432_v1, %v349_v63 }
 0x337   :  { %v576_v2 = vpop.f32.mrf.mxu1 }
 0x338   :  { %610 = vtanh.f32 %v433_v0 }
 0x339   :  { %v435_v3 = vpop.f32.mrf.mxu1 }
 0x33b   :  { %v577_v4 = vpop.f32.mrf.mxu1 }
 0x345   :  { %v611_v5 = vpop.eup %610 }
 0x346   :  { %440 = vst.msk [vmem:[#allocation7] sm:$0xff] %vm439_vm2, %v611_v5 }
 0x347   :  { %663 = shalt.err (!%p660_p0)
}
 0x348   :  { %450 = dma.vmem_to_hbm [thread:$0]  %s448_s1, 128, %s750_s2, [#allocation4]  }
 0x349   :  { %676 = dma.done.wait [#allocation4], 128  }
 0x34a   :  { %677 = vsyncadd [#allocation4], 4294967168 }
 0x34b   :  { %454 = vsyncpa [#allocation3], 1 }
 0x34c   :  { %455 = vsyncpa [#allocation6], 1 }
 0x34d   :  { %456 = vsyncpa [#allocation4], 1 }

</bundles_post_ra>
